<compile_context>
chip_gen: v5e
topology: v5e:2x2
jax: 0.10.0
libtpu: 0.0.40
codegen_flags: <defaults>
</compile_context>

<pallas_src>
import jax
import jax.numpy as jnp
from jax.experimental import pallas as pl
from jax.experimental.pallas import tpu as pltpu


def _round_up(x, m):
    return (x + m - 1) // m * m


def step_emb_kernel(t_ref, tab_ref, b1_ref, w2_ref, b2_ref, o_ref):
    t = t_ref[...]                                   # (B, 1) float32
    B = t.shape[0]
    T = tab_ref.shape[0]

    # --- interpolation weights (single matrix, replaces 2 one-hot gathers) ---
    low = jnp.floor(t)
    frac = t - low                                   # (B, 1), in [0, 1)
    low_i = jnp.clip(low, 0.0, T - 1).astype(jnp.int32)
    high_i = jnp.clip(jnp.ceil(t), 0.0, T - 1).astype(jnp.int32)

    ids = jax.lax.broadcasted_iota(jnp.int32, (B, T), 1)
    w_interp = (jnp.where(ids == low_i, 1.0 - frac, 0.0)
                + jnp.where(ids == high_i, frac, 0.0))   # (B, T) f32

    # --- gather + lerp + Linear-1 fused into one matmul (w1 pre-folded) ---
    h = jnp.dot(w_interp, tab_ref[...],
                preferred_element_type=jnp.float32) + b1_ref[...]
    h = h * jax.nn.sigmoid(h)                        # SiLU (EUP slot)

    # --- Linear-2 + SiLU ---
    y = jnp.dot(h, w2_ref[...],
                preferred_element_type=jnp.float32) + b2_ref[...]
    y = y * jax.nn.sigmoid(y)                        # SiLU

    o_ref[...] = y.astype(o_ref.dtype)


def prepare_step_embedding_params(embedding, w1, b1, w2, b2, *, pad_hidden_to=128):
    """One-time parameter preparation (hoisted out of the per-step path).

    Folds Linear-1 into the embedding table (gather/lerp and Linear-1 are both
    linear => exact up to f32 accumulation order) and zero-pads the hidden dim
    to a lane-dense multiple of 128 (exact: SiLU(0)=0, padded w2 rows are 0).
    """
    embedding = embedding.astype(jnp.float32)
    w1 = w1.astype(jnp.float32)
    b1 = b1.astype(jnp.float32)
    w2 = w2.astype(jnp.float32)
    b2 = b2.astype(jnp.float32)

    table2 = jnp.dot(embedding, w1, preferred_element_type=jnp.float32)  # (T, H)
    T, H = table2.shape
    D_out = w2.shape[1]

    H_pad = _round_up(max(H, pad_hidden_to), 128)
    if H_pad != H:
        table2 = jnp.pad(table2, ((0, 0), (0, H_pad - H)))
        b1 = jnp.pad(b1, (0, H_pad - H))
        w2 = jnp.pad(w2, ((0, H_pad - H), (0, 0)))

    return {
        "table2": table2,                    # (T, H_pad) f32
        "b1": b1.reshape(1, H_pad),          # (1, H_pad) f32
        "w2": w2,                            # (H_pad, D_out) f32
        "b2": b2.reshape(1, D_out),          # (1, D_out) f32
    }


def diffusion_step_embedding(t, params):
    """t: (B,) float32 timesteps in [0, T-1]. Returns (B, D_out) float32."""
    B = t.shape[0]
    table2 = params["table2"]
    b1 = params["b1"]
    w2 = params["w2"]
    b2 = params["b2"]
    T, H = table2.shape
    D_out = w2.shape[1]
    t2 = t.reshape(B, 1).astype(jnp.float32)

    cost = pl.CostEstimate(
        flops=2 * (B * T * H + B * H * D_out),
        transcendentals=B * (H + D_out),
        bytes_accessed=4 * (t2.size + table2.size + b1.size + w2.size
                            + b2.size + B * D_out),
    )

    vmem_spec = pl.BlockSpec(memory_space=pltpu.MemorySpace.VMEM)
    return pl.pallas_call(
        step_emb_kernel,
        out_shape=jax.ShapeDtypeStruct((B, D_out), jnp.float32),
        in_specs=[vmem_spec] * 5,
        out_specs=vmem_spec,
        cost_estimate=cost,
    )(t2, params["table2"], params["b1"], params["w2"], params["b2"])


def precompute_schedule_embeddings(schedule_t, params):
    """If the sampler's timestep schedule is known, compute ALL step embeddings
    in one batched call (M = num_steps fills MXU rows) and index rows later."""
    return diffusion_step_embedding(schedule_t.astype(jnp.float32), params)


def make_embedding_table(max_timesteps, step_emb_in_dim):
    half = step_emb_in_dim // 2
    steps = jnp.arange(max_timesteps, dtype=jnp.float32)[:, None]
    dims = jnp.arange(half, dtype=jnp.float32)[None, :]
    emb = 10.0 ** (dims * 4.0 / (half - 1))
    table = steps * emb
    return jnp.concatenate([jnp.sin(table), jnp.cos(table)], axis=1)  # (T, D_in)


def reference_forward(t, embedding, w1, b1, w2, b2):
    # Pure-JAX reference mirroring the PyTorch module (float timestep path).
    low = jnp.floor(t).astype(jnp.int32)
    high = jnp.ceil(t).astype(jnp.int32)
    low_val = embedding[low]
    high_val = embedding[high]
    x = low_val + (high_val - low_val) * (t - low.astype(jnp.float32))[:, None]
    h = jax.nn.silu(x @ w1 + b1)
    return jax.nn.silu(h @ w2 + b2)


if __name__ == "__main__":
    max_timesteps = 64
    step_emb_in_dim = 32
    step_emb_hidden_dim = 64
    step_emb_out_dim = 128
    batch = 8

    key = jax.random.PRNGKey(0)
    k1, k2, k3, k4, kt = jax.random.split(key, 5)

    # Deterministic synthetic parameters (PyTorch-Linear-like uniform init),
    # stored as (in_dim, out_dim).
    bound1 = 1.0 / jnp.sqrt(step_emb_in_dim)
    bound2 = 1.0 / jnp.sqrt(step_emb_hidden_dim)
    w1 = jax.random.uniform(k1, (step_emb_in_dim, step_emb_hidden_dim),
                            jnp.float32, -bound1, bound1)
    b1 = jax.random.uniform(k2, (step_emb_hidden_dim,), jnp.float32, -bound1, bound1)
    w2 = jax.random.uniform(k3, (step_emb_hidden_dim, step_emb_out_dim),
                            jnp.float32, -bound2, bound2)
    b2 = jax.random.uniform(k4, (step_emb_out_dim,), jnp.float32, -bound2, bound2)

    embedding = make_embedding_table(max_timesteps, step_emb_in_dim)

    # One-time parameter prep (table fold + pad + casts), outside the step loop.
    params = jax.tree_util.tree_map(
        jax.block_until_ready,
        prepare_step_embedding_params(embedding, w1, b1, w2, b2))

    # Float timesteps (exercises the interpolation path), mixed with a couple
    # of exact-integer timesteps (frac == 0 / low == high edge case).
    t = jax.random.uniform(kt, (batch,), jnp.float32, 0.0, float(max_timesteps - 1))
    t = t.at[0].set(0.0).at[1].set(float(max_timesteps - 1)).at[2].set(17.0)

    out = diffusion_step_embedding(t, params)
    out = jax.block_until_ready(out)

    ref = reference_forward(t, embedding, w1, b1, w2, b2)
    assert out.shape == (batch, step_emb_out_dim)
    # Folding Linear-1 into the table reorders f32 accumulation -> 1e-4 tol.
    assert jnp.allclose(out, ref, atol=1e-4, rtol=1e-4), "mismatch vs reference"

    # Whole-schedule precompute path (one batched call, fills MXU rows).
    schedule = jnp.arange(max_timesteps, dtype=jnp.float32)
    sched_out = jax.block_until_ready(precompute_schedule_embeddings(schedule, params))
    sched_ref = reference_forward(schedule, embedding, w1, b1, w2, b2)
    assert sched_out.shape == (max_timesteps, step_emb_out_dim)
    assert jnp.allclose(sched_out, sched_ref, atol=1e-4, rtol=1e-4), "schedule mismatch"

    print("KERNEL_OK")
</pallas_src>

<mosaic_0001>
module attributes {stable_mosaic.version = 11 : i64} {
  func.func @step_emb_kernel(%arg0: memref<8x1xf32, #tpu.memory_space<vmem>>, %arg1: memref<64x128xf32, #tpu.memory_space<vmem>>, %arg2: memref<1x128xf32, #tpu.memory_space<vmem>>, %arg3: memref<128x128xf32, #tpu.memory_space<vmem>>, %arg4: memref<1x128xf32, #tpu.memory_space<vmem>>, %arg5: memref<8x128xf32, #tpu.memory_space<vmem>>) attributes {dimension_semantics = [], scalar_prefetch = 0 : i64, scratch_operands = 0 : i64, tpu.core_type = #tpu.core_type<tc>} {
    %c0 = arith.constant 0 : index
    %c0_0 = arith.constant 0 : index
    %0 = vector.load %arg0[%c0, %c0_0] : memref<8x1xf32, #tpu.memory_space<vmem>>, vector<8x1xf32>
    %1 = math.floor %0 : vector<8x1xf32>
    %2 = arith.subf %0, %1 : vector<8x1xf32>
    %cst = arith.constant 0.000000e+00 : f32
    %c63_i32 = arith.constant 63 : i32
    %3 = vector.broadcast %cst : f32 to vector<8x1xf32>
    %4 = arith.maximumf %3, %1 : vector<8x1xf32>
    %5 = arith.sitofp %c63_i32 : i32 to f32
    %6 = vector.broadcast %5 : f32 to vector<8x1xf32>
    %7 = arith.minimumf %6, %4 : vector<8x1xf32>
    %8 = arith.fptosi %7 : vector<8x1xf32> to vector<8x1xi32>
    %9 = math.ceil %0 : vector<8x1xf32>
    %cst_1 = arith.constant 0.000000e+00 : f32
    %c63_i32_2 = arith.constant 63 : i32
    %10 = vector.broadcast %cst_1 : f32 to vector<8x1xf32>
    %11 = arith.maximumf %10, %9 : vector<8x1xf32>
    %12 = arith.sitofp %c63_i32_2 : i32 to f32
    %13 = vector.broadcast %12 : f32 to vector<8x1xf32>
    %14 = arith.minimumf %13, %11 : vector<8x1xf32>
    %15 = arith.fptosi %14 : vector<8x1xf32> to vector<8x1xi32>
    %16 = tpu.iota {dimensions = array<i32: 1>} : vector<8x64xi32>
    %17 = vector.broadcast %8 : vector<8x1xi32> to vector<8x64xi32>
    %18 = arith.cmpi eq, %16, %17 : vector<8x64xi32>
    %cst_3 = arith.constant 1.000000e+00 : f32
    %19 = vector.broadcast %cst_3 : f32 to vector<8x1xf32>
    %20 = arith.subf %19, %2 : vector<8x1xf32>
    %cst_4 = arith.constant 0.000000e+00 : f32
    %21 = vector.shape_cast %20 : vector<8x1xf32> to vector<8x1xf32>
    %22 = vector.broadcast %21 : vector<8x1xf32> to vector<8x64xf32>
    %23 = vector.broadcast %cst_4 : f32 to vector<8x64xf32>
    %24 = arith.select %18, %22, %23 : vector<8x64xi1>, vector<8x64xf32>
    %25 = vector.broadcast %15 : vector<8x1xi32> to vector<8x64xi32>
    %26 = arith.cmpi eq, %16, %25 : vector<8x64xi32>
    %cst_5 = arith.constant 0.000000e+00 : f32
    %27 = vector.shape_cast %2 : vector<8x1xf32> to vector<8x1xf32>
    %28 = vector.broadcast %27 : vector<8x1xf32> to vector<8x64xf32>
    %29 = vector.broadcast %cst_5 : f32 to vector<8x64xf32>
    %30 = arith.select %26, %28, %29 : vector<8x64xi1>, vector<8x64xf32>
    %31 = arith.addf %24, %30 : vector<8x64xf32>
    %c0_6 = arith.constant 0 : index
    %c0_7 = arith.constant 0 : index
    %32 = vector.load %arg1[%c0_6, %c0_7] : memref<64x128xf32, #tpu.memory_space<vmem>>, vector<64x128xf32>
    %cst_8 = arith.constant dense<0.000000e+00> : vector<8x128xf32>
    %33 = tpu.matmul %31, %32, %cst_8 {dimension_numbers = #tpu.dot_dimension_numbers<[1], [0], [0], [1], [0, 0, 1, 1], [], []>} : vector<8x64xf32>, vector<64x128xf32>, vector<8x128xf32> -> vector<8x128xf32>
    %c0_9 = arith.constant 0 : index
    %c0_10 = arith.constant 0 : index
    %34 = vector.load %arg2[%c0_9, %c0_10] : memref<1x128xf32, #tpu.memory_space<vmem>>, vector<1x128xf32>
    %35 = vector.broadcast %34 : vector<1x128xf32> to vector<8x128xf32>
    %36 = arith.addf %33, %35 : vector<8x128xf32>
    %37 = arith.negf %36 : vector<8x128xf32>
    %38 = math.exp %37 : vector<8x128xf32>
    %cst_11 = arith.constant 1.000000e+00 : f32
    %39 = vector.broadcast %cst_11 : f32 to vector<8x128xf32>
    %40 = arith.addf %39, %38 : vector<8x128xf32>
    %41 = arith.divf %39, %40 : vector<8x128xf32>
    %42 = arith.mulf %36, %41 : vector<8x128xf32>
    %c0_12 = arith.constant 0 : index
    %c0_13 = arith.constant 0 : index
    %43 = vector.load %arg3[%c0_12, %c0_13] : memref<128x128xf32, #tpu.memory_space<vmem>>, vector<128x128xf32>
    %cst_14 = arith.constant dense<0.000000e+00> : vector<8x128xf32>
    %44 = tpu.matmul %42, %43, %cst_14 {dimension_numbers = #tpu.dot_dimension_numbers<[1], [0], [0], [1], [0, 0, 1, 1], [], []>} : vector<8x128xf32>, vector<128x128xf32>, vector<8x128xf32> -> vector<8x128xf32>
    %c0_15 = arith.constant 0 : index
    %c0_16 = arith.constant 0 : index
    %45 = vector.load %arg4[%c0_15, %c0_16] : memref<1x128xf32, #tpu.memory_space<vmem>>, vector<1x128xf32>
    %46 = vector.broadcast %45 : vector<1x128xf32> to vector<8x128xf32>
    %47 = arith.addf %44, %46 : vector<8x128xf32>
    %48 = arith.negf %47 : vector<8x128xf32>
    %49 = math.exp %48 : vector<8x128xf32>
    %cst_17 = arith.constant 1.000000e+00 : f32
    %50 = vector.broadcast %cst_17 : f32 to vector<8x128xf32>
    %51 = arith.addf %50, %49 : vector<8x128xf32>
    %52 = arith.divf %50, %51 : vector<8x128xf32>
    %53 = arith.mulf %47, %52 : vector<8x128xf32>
    %c0_18 = arith.constant 0 : index
    %c0_19 = arith.constant 0 : index
    %54 = vector.load %arg5[%c0_18, %c0_19] : memref<8x128xf32, #tpu.memory_space<vmem>>, vector<8x128xf32>
    tpu.vector_store %arg5[%c0_18, %c0_19], %53 {strides = array<i32>} : memref<8x128xf32, #tpu.memory_space<vmem>>, vector<8x128xf32>,
    return
  }
}

</mosaic_0001>

<bundles_post_ra>
// kernel: tpu_custom_call.1
= control target key start
LH: loop header
LB: loop body
LE: loop exit
PB: predicated region body
PF: predicated region fallthrough
CT: control target
= control target key end

     0   :  { %10 = vsyncpa [#allocation3], 0  ;;  %s379_s0 = inlined_call_operand.vmem [shape: f32[8,1], index: 0, kind: input, shape index: {}]   ;;  %s380_s1 = inlined_call_operand.hbm [shape: f32[64,128], index: 1, kind: input, shape index: {}]   ;;  %s381_s2 = inlined_call_operand.vmem [shape: f32[1,128], index: 2, kind: input, shape index: {}]   ;;  %s382_s3 = inlined_call_operand.hbm [shape: f32[128,128], index: 3, kind: input, shape index: {}]   ;;  %s383_s4 = inlined_call_operand.vmem [shape: f32[1,128], index: 4, kind: input, shape index: {}]   ;;  %s384_s5 = inlined_call_operand.hbm [shape: f32[8,128], index: 5, kind: output, shape index: {}]  }
   0x1   :  { %11 = vsyncpa [#allocation6], 0 }
   0x2   :  { %12 = vsyncpa [#allocation4], 0  ;;  %s19_s20 = sshll.u32 %s380_s1, 4  ;;  %s325_s21 = smov [#allocation2]   ;;  %s20_s20 = int_to_ptr.hbm [resolvable:$true] %s19_s20 }
   0x3   :  { %s21_s22 = sshll.u32 %s325_s21, 4  ;;  %s34_s25 = sshll.u32 %s382_s3, 4  ;;  %s22_s22 = int_to_ptr.vmem [resolvable:$true] %s21_s22  ;;  %s35_s25 = int_to_ptr.hbm [resolvable:$true] %s34_s25 }
   0x4   :  { %s326_s26 = smov 128   ;;  %s327_s27 = smov 8  }
   0x5   :  { %27 = dma.hbm_to_vmem [thread:$0]  %s20_s20, 1024, %s22_s22, [#allocation3], %s326_s26, %s326_s26, %s327_s27  }
   0x6   :  { %s328_s28 = smov [#allocation5]  }
   0x7   :  { %s36_s29 = sshll.u32 %s328_s28, 4  ;;  %s37_s29 = int_to_ptr.vmem [resolvable:$true] %s36_s29 }
   0x8   :  { %42 = dma.hbm_to_vmem [thread:$0]  %s35_s25, 2048, %s37_s29, [#allocation6], %s326_s26, %s326_s26, %s327_s27  }
   0x9   :  { %319 = dma.done.wait [#allocation3], 1024  }
   0xa   :  { %320 = vsyncadd [#allocation3], 4294966272 }
   0xb   :  { %321 = dma.done.wait [#allocation6], 2048  }
   0xc   :  { %322 = vsyncadd [#allocation6], 4294965248  ;;  %v329_v0 = vmov 0   ;;  %v53_v1 = vld [vmem:[%s379_s0] sm:$0xff]  ;;  %v94_v2 = vld [vmem:[#allocation2 + $0x38] sm:$0xff]  ;;  %v63_v21 = vlaneseq  ;;  %vm99_vm2 = vcmask 523264  }
   0xd   :  { %236 = vset.pattern.permute.xlu1 %v329_v0  ;;  %235 = vset.pattern.permute.xlu0 %v329_v0  ;;  %v54_v3 = vfloor.f32 %v53_v1  ;;  %v59_v4 = vceil.f32 %v53_v1  ;;  %v93_v13 = vld [vmem:[#allocation2 + $0x30] sm:$0xff]  ;;  %v92_v14 = vld [vmem:[#allocation2 + $0x28] sm:$0xff]  ;;  %v91_v15 = vld [vmem:[#allocation2 + $0x20] sm:$0xff]  ;;  %s330_s7 = smov [#allocation7]   ;;  %s211_s10 = sshll.u32 %s384_s5, 4  ;;  %s212_s10 = int_to_ptr.hbm [resolvable:$true] %s211_s10 }
   0xe   :  { %111 = vmatpush.msra.mxu0 %v94_v2  ;;  %v90_v16 = vld [vmem:[#allocation2 + $0x18] sm:$0xff]  ;;  %v89_v17 = vld [vmem:[#allocation2 + $0x10] sm:$0xff]  ;;  %v88_v18 = vld [vmem:[#allocation2 + $0x8] sm:$0xff]  ;;  %v64_v23 = vand.u32 127, %v63_v21 }
   0xf   :  { %v55_v5 = vsub.f32 %v53_v1, %v54_v3  ;;  %v56_v6 = vmax.f32 %v54_v3, 0.0  ;;  %v60_v9 = vmax.f32 %v59_v4, 0.0  ;;  %v87_v19 = vld [vmem:[#allocation2] sm:$0xff]  ;;  %v158_v29 = vld [vmem:[#allocation5 + $0x78] sm:$0xff]  ;;  %v157_v30 = vld [vmem:[#allocation5 + $0x70] sm:$0xff] }
  0x10   :  { %112 = vmatpush.msra.mxu0 %v93_v13  ;;  %163 = vmatpush.msra.mxu1 %v158_v29  ;;  %v156_v31 = vld [vmem:[#allocation5 + $0x68] sm:$0xff]  ;;  %v155_v32 = vld [vmem:[#allocation5 + $0x60] sm:$0xff]  ;;  %v154_v33 = vld [vmem:[#allocation5 + $0x58] sm:$0xff] }
  0x11   :  { %v69_v7 = vsub.f32 1.0, %v55_v5  ;;  %v57_v8 = vmin.f32 %v56_v6, 63.0  ;;  %v61_v11 = vmin.f32 %v60_v9, 63.0  ;;  %v153_v34 = vld [vmem:[#allocation5 + $0x50] sm:$0xff]  ;;  %v152_v35 = vld [vmem:[#allocation5 + $0x48] sm:$0xff]  ;;  %v151_v36 = vld [vmem:[#allocation5 + $0x40] sm:$0xff] }
  0x12   :  { %113 = vmatpush.msra.mxu0 %v92_v14  ;;  %164 = vmatpush.msra.mxu1 %v157_v30  ;;  %v150_v37 = vld [vmem:[#allocation5 + $0x38] sm:$0xff]  ;;  %v149_v38 = vld [vmem:[#allocation5 + $0x30] sm:$0xff]  ;;  %v148_v39 = vld [vmem:[#allocation5 + $0x28] sm:$0xff] }
  0x13   :  { %72 = vperm.xlu1 %236, %v69_v7   ;;  %v226_v10 = vcvt.f32.s32 %v57_v8  ;;  %v228_v12 = vcvt.f32.s32 %v61_v11  ;;  %v147_v40 = vld [vmem:[#allocation5 + $0x20] sm:$0xff]  ;;  %v146_v41 = vld [vmem:[#allocation5 + $0x18] sm:$0xff]  ;;  %v145_v42 = vld [vmem:[#allocation5 + $0x10] sm:$0xff] }
  0x14   :  { %114 = vmatpush.msra.mxu0 %v91_v15  ;;  %165 = vmatpush.msra.mxu1 %v156_v31  ;;  %v144_v43 = vld [vmem:[#allocation5 + $0x8] sm:$0xff]  ;;  %v237_v44 = vld [vmem:[%s381_s2] ss:$0 sm:$0xff] }
  0x15   :  { %66 = vperm.xlu0 %235, %v226_v10   ;;  %v143_v45 = vld [vmem:[#allocation5] sm:$0xff] }
  0x16   :  { %115 = vmatpush.msra.mxu0 %v90_v16  ;;  %166 = vmatpush.msra.mxu1 %v155_v32  ;;  %v238_v62 = vld [vmem:[%s383_s4] ss:$0 sm:$0xff]  ;;  %s209_s4 = sshll.u32 %s330_s7, 4  ;;  %s210_s4 = int_to_ptr.vmem [resolvable:$true] %s209_s4 }
  0x18   :  { %116 = vmatpush.msra.mxu0 %v89_v17  ;;  %167 = vmatpush.msra.mxu1 %v154_v33 }
  0x1a   :  { %117 = vmatpush.msra.mxu0 %v88_v18  ;;  %168 = vmatpush.msra.mxu1 %v153_v34 }
  0x1b   :  { %82 = vperm.xlu1 %236, %v55_v5  }
  0x1c   :  { %118 = vmatpush.msra.mxu0 %v87_v19  ;;  %169 = vmatpush.msra.mxu1 %v152_v35 }
  0x1d   :  { %77 = vperm.xlu0 %235, %v228_v12  }
  0x1e   :  { %170 = vmatpush.msra.mxu1 %v151_v36 }
  0x20   :  { %171 = vmatpush.msra.mxu1 %v150_v37 }
  0x22   :  { %172 = vmatpush.msra.mxu1 %v149_v38 }
  0x24   :  { %173 = vmatpush.msra.mxu1 %v148_v39 }
  0x26   :  { %174 = vmatpush.msra.mxu1 %v147_v40 }
  0x28   :  { %175 = vmatpush.msra.mxu1 %v146_v41 }
  0x2a   :  { %176 = vmatpush.msra.mxu1 %v145_v42 }
  0x2c   :  { %177 = vmatpush.msra.mxu1 %v144_v43 }
  0x2e   :  { %178 = vmatpush.msra.mxu1 %v143_v45 }
  0x85   :  { %v73_v20 = vpop.permute.xlu1 %72 }
  0x87   :  { %v67_v22 = vpop.permute.xlu0 %66 }
  0x88   :  { %vm68_vm0 = vcmp.eq.s32.totalorder %v64_v23, %v67_v22 }
  0x89   :  { %v75_v26 = vsel %vm68_vm0, %v73_v20, 0.0 }
  0x8d   :  { %v83_v25 = vpop.permute.xlu1 %82 }
  0x8f   :  { %v78_v24 = vpop.permute.xlu0 %77 }
  0x90   :  { %vm79_vm1 = vcmp.eq.s32.totalorder %v64_v23, %v78_v24 }
  0x91   :  { %v85_v27 = vsel %vm79_vm1, %v83_v25, 0.0 }
  0x92   :  { %v86_v28 = vadd.f32 %v85_v27, %v75_v26 }
  0x94   :  { %222 = vmatmul.msk.f32.vlgmr.msra.gmra.mxu0 %vm99_vm2, %v86_v28 }
 0x111   :  { %v120_v46 = vpop.f32.mrf.mxu0 }
 0x112   :  { %v121_v47 = vadd.f32 %v237_v44, %v120_v46 }
 0x114   :  { %v223_v48 = vmul.f32 -1.442695, %v121_v47 }
 0x116   :  { %239 = vpow2.f32 %v223_v48 }
 0x11c   :  { %v240_v49 = vpop.eup %239 }
 0x11d   :  { %v126_v50 = vadd.f32 1.0, %v240_v49 }
 0x11f   :  { %241 = vrcp.f32 %v126_v50  ;;  %v138_v54 = vand.u32 2147483648, %v126_v50  ;;  %v136_v56 = vand.u32 2147483647, %v126_v50  ;;  %vm132_vm4 = vweird.f32 %v126_v50 }
 0x121   :  { %v139_v58 = vor.u32 1.1754944e-38, %v138_v54  ;;  %vm137_vm6 = vcmp.eq.f32.partialorder %v136_v56, 8.507059e+37 }
 0x125   :  { %v242_v51 = vpop.eup %241 }
 0x126   :  { %v128_v52 = vmul.f32 %v242_v51, %v126_v50  ;;  %vm133_vm3 = vweird.f32 %v242_v51 }
 0x127   :  { %vm134_vm5 = vmor %vm132_vm4, %vm133_vm3 }
 0x128   :  { %v129_v53 = vsub.f32 1.0, %v128_v52 }
 0x12a   :  { %v130_v55 = vmul.f32 %v242_v51, %v129_v53 }
 0x12c   :  { %v131_v57 = vadd.f32 %v242_v51, %v130_v55 }
 0x12e   :  { %v135_v59 = vsel %vm134_vm5, %v242_v51, %v131_v57 }
 0x12f   :  { %v140_v60 = vsel %vm137_vm6, %v139_v58, %v135_v59 }
 0x130   :  { %v142_v61 = vmul.f32 %v140_v60, %v121_v47 }
 0x132   :  { %179 = vmatmul.f32.vlgmr.msra.gmra.mxu1 %v142_v61 }
 0x1af   :  { %v180_v63 = vpop.f32.mrf.mxu1 }
 0x1b0   :  { %v181_v0 = vadd.f32 %v238_v62, %v180_v63 }
 0x1b2   :  { %v224_v1 = vmul.f32 -1.442695, %v181_v0 }
 0x1b4   :  { %243 = vpow2.f32 %v224_v1 }
 0x1ba   :  { %v244_v2 = vpop.eup %243 }
 0x1bb   :  { %v186_v3 = vadd.f32 1.0, %v244_v2 }
 0x1bd   :  { %245 = vrcp.f32 %v186_v3  ;;  %v198_v7 = vand.u32 2147483648, %v186_v3  ;;  %v196_v9 = vand.u32 2147483647, %v186_v3  ;;  %vm192_vm8 = vweird.f32 %v186_v3 }
 0x1bf   :  { %v199_v11 = vor.u32 1.1754944e-38, %v198_v7  ;;  %vm197_vm10 = vcmp.eq.f32.partialorder %v196_v9, 8.507059e+37 }
 0x1c3   :  { %v246_v4 = vpop.eup %245 }
 0x1c4   :  { %v188_v5 = vmul.f32 %v246_v4, %v186_v3  ;;  %vm193_vm7 = vweird.f32 %v246_v4 }
 0x1c5   :  { %vm194_vm9 = vmor %vm192_vm8, %vm193_vm7 }
 0x1c6   :  { %v189_v6 = vsub.f32 1.0, %v188_v5 }
 0x1c8   :  { %v190_v8 = vmul.f32 %v246_v4, %v189_v6 }
 0x1ca   :  { %v191_v10 = vadd.f32 %v246_v4, %v190_v8 }
 0x1cc   :  { %v195_v12 = vsel %vm194_vm9, %v246_v4, %v191_v10 }
 0x1cd   :  { %v200_v13 = vsel %vm197_vm10, %v199_v11, %v195_v12 }
 0x1ce   :  { %v202_v14 = vmul.f32 %v200_v13, %v181_v0 }
 0x1d0   :  { %203 = vst [vmem:[#allocation7] sm:$0xff] %v202_v14 }
 0x1d1   :  { %214 = dma.vmem_to_hbm [thread:$0]  %s210_s4, 128, %s212_s10, [#allocation4]  }
 0x1d2   :  { %323 = dma.done.wait [#allocation4], 128  }
 0x1d3   :  { %324 = vsyncadd [#allocation4], 4294967168 }
 0x1d4   :  { %219 = vsyncpa [#allocation3], 1 }
 0x1d5   :  { %220 = vsyncpa [#allocation6], 1 }
 0x1d6   :  { %221 = vsyncpa [#allocation4], 1 }

</bundles_post_ra>
